<compile_context>
chip_gen: v6e
topology: v6e:2x2x1
jax: 0.10.0
libtpu: 0.0.40
codegen_flags: <defaults>
</compile_context>

<pallas_src>
import functools

import jax
import jax.numpy as jnp
import numpy as np
from jax.experimental import pallas as pl
from jax.experimental.pallas import tpu as pltpu


def _focal_loss_kernel(logit_ref, tgt_ref, alpha_ref, out_ref, *,
                       gamma, smooth, num_class, use_alpha):
    logit = logit_ref[0]            # (C, R, 128)  f32 probabilities
    tgt = tgt_ref[0]                # (1, R, 128)  int32 class ids
    c, r, lanes = logit.shape

    cls = jax.lax.broadcasted_iota(jnp.int32, (c, r, lanes), 0)
    hot = cls == tgt                                    # (C, R, 128) bool

    lo = smooth / (num_class - 1)
    hi = 1.0 - smooth
    oh_smooth = jnp.where(hot, hi, lo)                  # fused one-hot + clamp

    # Reduce over the leading C axis: plain VPU adds across vregs (no XLU/MXU).
    pt = jnp.sum(oh_smooth * logit, axis=0) + smooth    # (R, 128)
    logpt = jnp.log(pt)                                 # EUP slot

    u = 1.0 - pt
    if gamma == 2:                                      # static special case
        focal = u * u
    else:
        focal = jnp.power(jnp.maximum(u, 0.0), gamma)

    loss = -(focal * logpt)                             # (R, 128)

    if use_alpha:
        alpha = alpha_ref[0]                            # (C, 1, 1)
        a_row = jnp.sum(jnp.where(hot, alpha, 0.0), axis=0)   # alpha[target]
        loss = a_row * loss

    # Per-tile lane partial sums (1, 128); final reduction happens in JAX.
    out_ref[...] = jnp.sum(loss, axis=0, keepdims=True)


def _pick_row_tile(r_total, max_rows):
    """Rows (of 128 lanes) per grid step: big, divisible, (8,128)-friendly."""
    if r_total <= max_rows:
        return r_total                       # block == full dim is always legal
    start = max_rows - (max_rows % 8)
    for rt in range(start, 0, -8):           # multiples of 8 that divide r_total
        if r_total % rt == 0:
            return rt
    return r_total                           # fallback: whole spatial extent


def focal_loss(logit_nchw, target, *, gamma=2, smooth=1e-5, alpha=None,
               balance_index=0, max_rows=64):
    """Focal loss forward.  NOTE: logits must already be probabilities
    (module default apply_nonlin=None)."""
    n, c, h, w = logit_nchw.shape
    hw = h * w
    m = n * hw
    # TODO(synk): pad H*W to a multiple of 128 (with masking) for odd spatial sizes.
    assert hw % 128 == 0, "H*W must be a multiple of 128"

    r_total = hw // 128
    r_tile = _pick_row_tile(r_total, max_rows)
    gj = r_total // r_tile                   # spatial tiles per image
    num_tiles = n * gj

    # Free reshapes: NCHW stays in native order (no transpose, no extra HBM pass).
    logit4 = logit_nchw.astype(jnp.float32).reshape(n, c, r_total, 128)
    tgt4 = target.astype(jnp.int32).reshape(n, 1, r_total, 128)

    # alpha handling mirrors the PyTorch module.
    use_alpha = alpha is not None
    if alpha is None:
        alpha_in = jnp.ones((1, c, 1, 1), jnp.float32)
    elif isinstance(alpha, float):
        a = np.full((c,), 1.0 - alpha, np.float32)
        a[balance_index] = alpha
        alpha_in = jnp.asarray(a).reshape(1, c, 1, 1)
    else:
        a = jnp.asarray(alpha, jnp.float32).reshape(c)
        a = a / jnp.sum(a)
        alpha_in = a.reshape(1, c, 1, 1)

    kernel = functools.partial(
        _focal_loss_kernel,
        gamma=gamma, smooth=float(smooth), num_class=c, use_alpha=use_alpha)

    partials = pl.pallas_call(
        kernel,
        out_shape=jax.ShapeDtypeStruct((1, num_tiles * 128), jnp.float32),
        grid=(n, gj),
        in_specs=[
            # logits tile: (1, C, r_tile, 128) — lane-dense along spatial axis
            pl.BlockSpec((1, c, r_tile, 128), lambda i, j: (i, 0, j, 0)),
            # target tile: (1, 1, r_tile, 128)
            pl.BlockSpec((1, 1, r_tile, 128), lambda i, j: (i, 0, j, 0)),
            # per-class alpha weights (resident)
            pl.BlockSpec((1, c, 1, 1), lambda i, j: (0, 0, 0, 0)),
        ],
        # lane-dense (1, 128) partial sums, one slab per grid step
        out_specs=pl.BlockSpec((1, 128), lambda i, j: (0, i * gj + j)),
        compiler_params=pltpu.CompilerParams(
            dimension_semantics=("parallel", "parallel"),
            vmem_limit_bytes=32 * 1024 * 1024),
    )(logit4, tgt4, alpha_in)

    # size_average=True -> mean over all N*H*W pixels.
    return jnp.sum(partials) / float(m)


def _focal_loss_reference(logit_nchw, target, *, gamma=2, smooth=1e-5):
    n, c, h, w = logit_nchw.shape
    l2 = jnp.transpose(logit_nchw, (0, 2, 3, 1)).reshape(-1, c).astype(jnp.float32)
    t = target.reshape(-1)
    oh = jax.nn.one_hot(t, c, dtype=jnp.float32)
    oh = jnp.clip(oh, smooth / (c - 1), 1.0 - smooth)
    pt = jnp.sum(oh * l2, axis=1) + smooth
    logpt = jnp.log(pt)
    alpha_row = jnp.ones((c,), jnp.float32)[t]
    loss = -alpha_row * jnp.power(1.0 - pt, gamma) * logpt
    return jnp.mean(loss)


if __name__ == "__main__":
    key = jax.random.PRNGKey(0)
    k1, k2 = jax.random.split(key)

    N, C, H, W = 2, 4, 16, 16          # M = 512 pixels
    raw = jax.random.normal(k1, (N, C, H, W), jnp.float32)
    # apply_nonlin=None in the module => inputs are already probabilities
    probs = jax.nn.softmax(raw, axis=1)
    target = jax.random.randint(k2, (N, 1, H, W), 0, C, jnp.int32)

    out = focal_loss(probs, target, gamma=2, smooth=1e-5)
    out = jax.block_until_ready(out)

    ref = _focal_loss_reference(probs, target, gamma=2, smooth=1e-5)
    ref = jax.block_until_ready(ref)

    assert jnp.allclose(out, ref, rtol=1e-5, atol=1e-6), (out, ref)
    print("KERNEL_OK")
</pallas_src>

<mosaic_0001>
module attributes {stable_mosaic.version = 11 : i64} {
  func.func @_focal_loss_kernel(%arg0: i32, %arg1: i32, %arg2: memref<1x4x2x128xf32, #tpu.memory_space<vmem>>, %arg3: memref<1x1x2x128xi32, #tpu.memory_space<vmem>>, %arg4: memref<1x4x1x1xf32, #tpu.memory_space<vmem>>, %arg5: memref<1x128xf32, #tpu.memory_space<vmem>>) attributes {dimension_semantics = [#tpu.dimension_semantics<parallel>, #tpu.dimension_semantics<parallel>], iteration_bounds = array<i64: 2, 1>, scalar_prefetch = 0 : i64, scratch_operands = 0 : i64, tpu.core_type = #tpu.core_type<tc>, window_params = [{transform_indices = @transform_0, window_bounds = array<i64: 1, 4, 2, 128>}, {transform_indices = @transform_1, window_bounds = array<i64: 1, 1, 2, 128>}, {pipeline_mode = #tpu.pipeline_mode<synchronous>, transform_indices = @transform_2, window_bounds = array<i64: 1, 4, 1, 1>}, {transform_indices = @transform_3, window_bounds = array<i64: 1, 128>}]} {
    %c0 = arith.constant 0 : index
    %c0_0 = arith.constant 0 : index
    %c0_1 = arith.constant 0 : index
    %c0_2 = arith.constant 0 : index
    %0 = vector.load %arg2[%c0, %c0_0, %c0_1, %c0_2] : memref<1x4x2x128xf32, #tpu.memory_space<vmem>>, vector<1x4x2x128xf32>
    %1 = vector.shape_cast %0 : vector<1x4x2x128xf32> to vector<4x2x128xf32>
    %c0_3 = arith.constant 0 : index
    %c0_4 = arith.constant 0 : index
    %c0_5 = arith.constant 0 : index
    %c0_6 = arith.constant 0 : index
    %2 = vector.load %arg3[%c0_3, %c0_4, %c0_5, %c0_6] : memref<1x1x2x128xi32, #tpu.memory_space<vmem>>, vector<1x1x2x128xi32>
    %3 = vector.shape_cast %2 : vector<1x1x2x128xi32> to vector<1x2x128xi32>
    %4 = tpu.iota {dimensions = array<i32: 0>} : vector<4x2x128xi32>
    %5 = vector.broadcast %3 : vector<1x2x128xi32> to vector<4x2x128xi32>
    %6 = arith.cmpi eq, %4, %5 : vector<4x2x128xi32>
    %cst = arith.constant 0.999989986 : f32
    %cst_7 = arith.constant 3.33333332E-6 : f32
    %7 = vector.broadcast %cst : f32 to vector<4x2x128xf32>
    %8 = vector.broadcast %cst_7 : f32 to vector<4x2x128xf32>
    %9 = arith.select %6, %7, %8 : vector<4x2x128xi1>, vector<4x2x128xf32>
    %10 = arith.mulf %9, %1 : vector<4x2x128xf32>
    %cst_8 = arith.constant dense<0.000000e+00> : vector<2x128xf32>
    %11 = vector.multi_reduction <add>, %10, %cst_8 [0] : vector<4x2x128xf32> to vector<2x128xf32>
    %cst_9 = arith.constant 9.99999974E-6 : f32
    %12 = vector.broadcast %cst_9 : f32 to vector<2x128xf32>
    %13 = arith.addf %11, %12 : vector<2x128xf32>
    %14 = math.log %13 : vector<2x128xf32>
    %cst_10 = arith.constant 1.000000e+00 : f32
    %15 = vector.broadcast %cst_10 : f32 to vector<2x128xf32>
    %16 = arith.subf %15, %13 : vector<2x128xf32>
    %17 = arith.mulf %16, %16 : vector<2x128xf32>
    %18 = arith.mulf %17, %14 : vector<2x128xf32>
    %cst_11 = arith.constant 0.000000e+00 : f32
    %19 = vector.broadcast %cst_11 : f32 to vector<2x128xf32>
    %20 = arith.subf %19, %18 : vector<2x128xf32>
    %cst_12 = arith.constant dense<0.000000e+00> : vector<128xf32>
    %21 = vector.multi_reduction <add>, %20, %cst_12 [0] : vector<2x128xf32> to vector<128xf32>
    %22 = vector.shape_cast %21 : vector<128xf32> to vector<1x128xf32>
    %c0_13 = arith.constant 0 : index
    %c0_14 = arith.constant 0 : index
    %23 = vector.load %arg5[%c0_13, %c0_14] : memref<1x128xf32, #tpu.memory_space<vmem>>, vector<1x128xf32>
    tpu.vector_store %arg5[%c0_13, %c0_14], %22 {strides = array<i32>} : memref<1x128xf32, #tpu.memory_space<vmem>>, vector<1x128xf32>,
    return
  }
  func.func @transform_0(%arg0: i32, %arg1: i32) -> (i32, i32, i32, i32) {
    %c0_i32 = arith.constant 0 : i32
    %c0_i32_0 = arith.constant 0 : i32
    %c0_i32_1 = arith.constant 0 : i32
    return %arg0, %c0_i32, %arg1, %c0_i32_0 : i32, i32, i32, i32
  }
  func.func @transform_1(%arg0: i32, %arg1: i32) -> (i32, i32, i32, i32) {
    %c0_i32 = arith.constant 0 : i32
    %c0_i32_0 = arith.constant 0 : i32
    %c0_i32_1 = arith.constant 0 : i32
    return %arg0, %c0_i32, %arg1, %c0_i32_0 : i32, i32, i32, i32
  }
  func.func @transform_2(%arg0: i32, %arg1: i32) -> (i32, i32, i32, i32) {
    %c0_i32 = arith.constant 0 : i32
    %c0_i32_0 = arith.constant 0 : i32
    %c0_i32_1 = arith.constant 0 : i32
    %c0_i32_2 = arith.constant 0 : i32
    %c0_i32_3 = arith.constant 0 : i32
    return %c0_i32, %c0_i32_0, %c0_i32_1, %c0_i32_2 : i32, i32, i32, i32
  }
  func.func @transform_3(%arg0: i32, %arg1: i32) -> (i32, i32) {
    %c1_i32 = arith.constant 1 : i32
    %0 = arith.muli %arg0, %c1_i32 : i32
    %1 = arith.addi %0, %arg1 : i32
    %c0_i32 = arith.constant 0 : i32
    %c0_i32_0 = arith.constant 0 : i32
    return %c0_i32, %1 : i32, i32
  }
}

</mosaic_0001>

<bundles_post_ra>
// kernel: tpu_custom_call.1
= control target key start
LH: loop header
LB: loop body
LE: loop exit
PB: predicated region body
PF: predicated region fallthrough
CT: control target
= control target key end

     0   :  { %8 = vsyncpa [#allocation3], 0  ;;  %s739_s0 = inlined_call_operand.hbm [shape: f32[2,4,2,128], index: 0, kind: input, shape index: {}]   ;;  %s740_s1 = inlined_call_operand.vmem [shape: s32[2,1,2,128], index: 1, kind: input, shape index: {}]   ;;  %s741_s2 = inlined_call_operand.vmem [shape: f32[1,4,1,1], index: 2, kind: input, shape index: {}]   ;;  %s742_s3 = inlined_call_operand.hbm [shape: f32[1,256], index: 3, kind: output, shape index: {}]  }
   0x1   :  { %10 = vsyncpa [#allocation3 + $0x1], 0 }
   0x2   :  { %11 = vsyncpa [#allocation4], 0 }
   0x3   :  { %13 = vsyncpa [#allocation4 + $0x1], 0  ;;  %s596_s12 = smov 0   ;;  %s598_s13 = smov 0  }
   0x4   :  { %s600_s14 = smov 0   ;;  %s602_s15 = smov 0  }
   0x5   :  { %s604_s16 = smov 0   ;;  %s606_s17 = smov 0  }
   0x6 LB: > { %s380_s2 = sadd.s32 4294967295, %s569_s17   ;;  %s381_s18 = sadd.s32 4294967294, %s569_s17   ;;  %s569_s17 = sphi %s606_s17, %s19_s17   ;;  %s565_s16 = sphi %s604_s16, %s753_s16   ;;  %s561_s15 = sphi %s602_s15, %s752_s15   ;;  %s557_s14 = sphi %s600_s14, %s751_s14   ;;  %s553_s13 = sphi %s598_s13, %s750_s13   ;;  %s549_s12 = sphi %s596_s12, %s749_s12  }
   0x7   : > { %s31_s19 = sadd.s32 1, %s565_s16  ;;  %s40_s20 = sadd.s32 1, %s557_s14 }
   0x8   : > { %p33_p0 = scmp.ge.s32.totalorder %s31_s19, 2  ;;  %p47_p1 = scmp.ne.s32.totalorder %s557_s14, %s553_s13 }
   0x9   : > { %p48_p2 = scmp.eq.s32.totalorder %s569_s17, 0  ;;  %p53_p3 = scmp.ne.s32.totalorder %s553_s13, %s549_s12 }
   0xa   : > { %s755_s19 = smov (%p33_p0, %s31_s19), 0  ;;  %p54_p5 = scmp.eq.s32.totalorder %s380_s2, 0 }
   0xb   : > { %p637_p4 = por %p48_p2, %p47_p1  ;;  %s35_s22 = ssub.s32 %s565_s16, %s755_s19 }
   0xc   : > { %p128_p6 = scmp.eq.s32.totalorder %s380_s2, 1  ;;  %p38_p7 = scmp.eq.s32.totalorder %s35_s22, 0 }
   0xd   : > { %p643_p8 = por %p54_p5, %p53_p3  ;;  %p134_p10 = scmp.eq.s32.totalorder %s381_s18, 1 }
   0xe   : > { %p647_p9 = por %p128_p6, %p47_p1  ;;  %p406_p13 = scmp.lt.s32.totalorder %s569_s17, 2 }
   0xf   : > { %s652_s25 = scalar_select %p38_p7, %s557_s14, %s40_s20  }
  0x10   : > { %p654_p11 = por %p134_p10, %p53_p3  ;;  %s157_s27 = sand.u32 1, %s557_s14  }
  0x11   : > { %s384_s28 = sshll.u32 %s157_s27, 3  ;;  %s393_s29 = sshll.u32 %s565_s16, 7 }
  0x12   : > { %s168_s5 = scalar_lea.hbm %s739_s0, %s393_s29  ;;  %s161_s6 = scalar_lea.vmem [#allocation2], %s384_s28 }
  0x13   : > { %s169_s7 = sshll.u32 %s161_s6, 4  ;;  %p667_p0 = pnand %p406_p13, %p637_p4  ;;  %s170_s7 = int_to_ptr.vmem [resolvable:$true] %s169_s7 }
  0x14   : > { %p387_p1 = scmp.ge.s32.totalorder %s569_s17, 1  ;;  %s158_s9 = scalar_lea.sflag [#allocation3], %s157_s27 }
  0x15   : > { %p463_p2 = pneg %p667_p0  ;;  %s474_s10 = scalar_lea.vmem %s170_s7, 128 }
  0x16   : > { %p475_p3 = scmp.ne.s32.totalorder %s170_s7, %s474_s10  ;;  %s571_s11 = smov [#allocation2]  }
  0x17   : > { %s479_s2 = sshll.u32 %s571_s11, 4  ;;  %s480_s2 = int_to_ptr.vmem [resolvable:$false] %s479_s2 }
  0x18   : > { %p477_p5 = pnand %p475_p3, %p463_p2  ;;  %s481_s18 = scalar_lea.vmem %s480_s2, 256 }
  0x19   : > { %p482_p7 = scmp.lt.s32.totalorder %s170_s7, %s480_s2  ;;  %p483_p10 = scmp.lt.s32.totalorder %s481_s18, %s474_s10 }
  0x1a   : > { %p478_p6 = pneg %p477_p5 }
  0x1b   : > { %p484_p12 = por %p483_p10, %p482_p7 }
  0x1d   : > { %p485_p4 = pnand %p484_p12, %p478_p6 }
  0x1f   : > { %488 = shalt.err (!%p485_p4)
}
  0x20   : > { %s572_s20 = smov 32   ;;  %s573_s21 = smov 2  }
  0x21   : > { %401 = dma.hbm_to_vmem [thread:$0]  (!%p667_p0), %s168_s5, 128, %s170_s7, %s158_s9, %s572_s20, %s572_s20, %s573_s21  }
  0x22   : > { %p187_p13 = scmp.lt.s32.totalorder %s569_s17, 3 }
  0x24   : > { %p188_p2 = pnand %p387_p1, %p187_p13 }
  0x25   : > { %s680_s22 = sand.u32 (!%p188_p2), 1, %s553_s13  }
  0x26   : > { %191 = sbr.rel (%p188_p2) target bundleno = 110 (0x6e), region = 32  ;;  %s388_s27 = sshll.u32 (!%p188_p2), %s680_s22, 3 }
  0x27   : > { %s194_s28 = scalar_lea.sflag (!%p188_p2), [#allocation3], %s680_s22  ;;  %s197_s29 = scalar_lea.vmem (!%p188_p2), [#allocation2], %s388_s27 }
  0x2b   : > { %540 = dma.done.wait (%p643_p8), %s194_s28, 128  }
  0x2c   : > { %542 = vsyncadd (%p643_p8), %s194_s28, 4294967168  ;;  %p226_p12 = scmp.lt.s32.totalorder %s561_s15, 1  ;;  %v234_v0 = vld [vmem:[%s197_s29] sm:$0x3]  ;;  %vm251_vm0 = vcmask 1041408   ;;  %s225_s23 = scalar_lea.vmem [#allocation5], %s680_s22 }
  0x2d   : > { %v235_v1 = vld [vmem:[%s197_s29 + $0x2] sm:$0x3]  ;;  %v236_v2 = vld [vmem:[%s197_s29 + $0x4] sm:$0x3]  ;;  %v237_v4 = vld [vmem:[%s197_s29 + $0x6] sm:$0x3] }
  0x2e   : > { %s227_s30 = scalar_select %p226_p12, %s561_s15, 1  ;;  %v574_v5 = vmov 3.3333333e-06  }
  0x2f   : > { %s288_s8 = sshll.u32 %s225_s23, 4  ;;  %s390_s9 = sshll.u32 %s561_s15, 4  ;;  %s289_s8 = int_to_ptr.vmem [resolvable:$true] %s288_s8 }
  0x30   : > { %s389_s4 = sshll.u32 %s227_s30, 1  ;;  %s286_s2 = scalar_lea.hbm %s742_s3, %s390_s9 }
  0x31   : > { %s232_s7 = scalar_lea.vmem %s740_s1, %s389_s4  ;;  %s275_s18 = scalar_lea.sflag [#allocation4], %s680_s22 }
  0x32   : > { %v238_v3 = vld [vmem:[%s232_s7] sm:$0x3]  ;;  %s489_s20 = scalar_lea.vmem %s289_s8, 16  ;;  %s575_s21 = smov [#allocation5]  }
  0x33   : > { %vm239_vm1 = vcmp.eq.s32.totalorder %v238_v3, 0  ;;  %vm240_vm2 = vcmp.eq.s32.totalorder %v238_v3, 1  ;;  %vm241_vm3 = vcmp.eq.s32.totalorder %v238_v3, 2  ;;  %vm242_vm4 = vcmp.eq.s32.totalorder %v238_v3, 3  ;;  %p490_p8 = scmp.ne.s32.totalorder %s289_s8, %s489_s20  ;;  %s493_s27 = sshll.u32 %s575_s21, 4  ;;  %s494_s27 = int_to_ptr.vmem [resolvable:$false] %s493_s27 }
  0x34   : > { %v243_v6 = vsel %vm239_vm1, 0.99999, %v574_v5  ;;  %v244_v7 = vsel %vm240_vm2, 0.99999, %v574_v5  ;;  %v245_v8 = vsel %vm241_vm3, 0.99999, %v574_v5  ;;  %p496_p3 = scmp.lt.s32.totalorder %s289_s8, %s494_s27 }
  0x35   : > { %v246_v9 = vsel %vm242_vm4, 0.99999, %v574_v5  ;;  %v247_v10 = vmul.f32 %v243_v6, %v234_v0  ;;  %v248_v11 = vmul.f32 %v244_v7, %v235_v1  ;;  %v249_v12 = vmul.f32 %v245_v8, %v236_v2  ;;  %p491_p0 = pnand %p490_p8, %p647_p9  ;;  %s495_s28 = scalar_lea.vmem %s494_s27, 32 }
  0x36   : > { %v250_v13 = vmul.f32 %v246_v9, %v237_v4  ;;  %p497_p5 = scmp.lt.s32.totalorder %s495_s28, %s489_s20 }
  0x37   : > { %v252_v14 = vsel %vm251_vm0, %v247_v10, 0.0  ;;  %v253_v15 = vsel %vm251_vm0, %v248_v11, 0.0  ;;  %v255_v16 = vsel %vm251_vm0, %v249_v12, 0.0  ;;  %p492_p1 = pneg %p491_p0 }
  0x38   : > { %v254_v17 = vadd.f32 %v253_v15, %v252_v14  ;;  %v257_v18 = vsel %vm251_vm0, %v250_v13, 0.0  ;;  %p498_p6 = por %p497_p5, %p496_p3 }
  0x3a   : > { %v256_v19 = vadd.f32 %v255_v16, %v254_v17  ;;  %p499_p7 = pnand %p498_p6, %p492_p1 }
  0x3c   : > { %v258_v20 = vadd.f32 %v257_v18, %v256_v19 }
  0x3e   : > { %v259_v21 = vadd.f32 1e-05, %v258_v20 }
  0x40   : > { %459 = vlog2.f32 %v259_v21  ;;  %v262_v22 = vsub.f32 1.0, %v259_v21 }
  0x42   : > { %v263_v23 = vmul.f32 %v262_v22, %v262_v22 }
  0x4d   : > { %v460_v24 = vpop.eup %459 }
  0x4e   : > { %v261_v25 = vmul.f32 0.6931472, %v460_v24 }
  0x50   : > { %v264_v26 = vmul.f32 %v263_v23, %v261_v25 }
  0x52   : > { %v265_v27 = vsub.f32 0.0, %v264_v26 }
  0x54   : > { %v266_v28 = vsel %vm251_vm0, %v265_v27, 0.0 }
  0x55   : > { %v267_v29 = vrot.slane %v266_v28, 4 }
  0x57   : > { %v268_v30 = vadd.f32 %v267_v29, %v266_v28 }
  0x59   : > { %v269_v31 = vrot.slane %v268_v30, 2 }
  0x5b   : > { %v270_v32 = vadd.f32 %v269_v31, %v268_v30 }
  0x5d   : > { %v271_v33 = vrot.slane %v270_v32, 1 }
  0x5f   : > { %v272_v34 = vadd.f32 %v271_v33, %v270_v32 }
  0x61   : > { %273 = vst [vmem:[%s225_s23] sm:$0x1] %v272_v34 }
  0x62   : > { %502 = shalt.err (!%p499_p7)
}
  0x63   : > { %s503_s15 = scalar_lea.hbm %s286_s2, 16  ;;  %s507_s30 = scalar_lea.hbm %s742_s3, 32 }
  0x64   : > { %p504_p10 = scmp.ne.s32.totalorder %s286_s2, %s503_s15  ;;  %p508_p2 = scmp.lt.s32.totalorder %s286_s2, %s742_s3 }
  0x65   : > { %p509_p12 = scmp.lt.s32.totalorder %s507_s30, %s503_s15 }
  0x66   : > { %p505_p4 = pnand %p504_p10, %p647_p9 }
  0x67   : > { %p510_p8 = por %p509_p12, %p508_p2 }
  0x68   : > { %p506_p13 = pneg %p505_p4 }
  0x6a   : > { %p511_p0 = pnand %p510_p8, %p506_p13 }
  0x6c   : > { %514 = shalt.err (!%p511_p0)
}
  0x6d   : > { %396 = dma.vmem_to_hbm [thread:$0]  (%p647_p9), %s289_s8, 16, %s286_s2, %s275_s18  }
  0x6e PF: > { %s300_s6 = sand.u32 1, %s549_s12   ;;  %p748_p1 = scmp.ge.s32.totalorder %s569_s17, 2 }
  0x6f   : > { %s301_s7 = scalar_lea.sflag [#allocation4], %s300_s6 }
  0x70   : > { %p403_p3 = pnand %p748_p1, %p654_p11 }
  0x72   : > { %p404_p5 = pneg %p403_p3 }
  0x74   : > { %544 = dma.done.wait (%p404_p5), %s301_s7, 16  }
  0x75   : > { %546 = vsyncadd (%p404_p5), %s301_s7, 4294967280  ;;  %s19_s17 = sadd.s32 1, %s569_s17   ;;  %s749_s12 = smov %s553_s13 }
  0x76   : > { %p16_p6 = scmp.ge.s32.totalorder %s19_s17, 4   ;;  %s750_s13 = smov %s557_s14 }
  0x77   : > { %s751_s14 = smov %s652_s25  ;;  %s752_s15 = smov %s565_s16 }
  0x78   : > { %s753_s16 = smov %s755_s19  ;;  %18 = sbr.rel (!%p16_p6) target bundleno = 6 (0x6), region = 80 }
  0x7d   :  { %305 = vsyncpa [#allocation3], 1 }
  0x7e   :  { %307 = vsyncpa [#allocation3 + $0x1], 1 }
  0x7f   :  { %308 = vsyncpa [#allocation4], 1 }
  0x80   :  { %310 = vsyncpa [#allocation4 + $0x1], 1 }

</bundles_post_ra>
